<compile_context>
chip_gen: v7x
topology: tpu7x:2x2x1
jax: 0.10.0
libtpu: 0.0.40
codegen_flags: <defaults>
</compile_context>

<pallas_src>
import functools

import jax
import jax.numpy as jnp
from jax import lax
from jax.experimental import pallas as pl
from jax.experimental.pallas import tpu as pltpu


def _softplus(x):
    # Numerically stable softplus: max(x, 0) + log(1 + exp(-|x|)); never overflows,
    # matches jax.nn.softplus to well below the test tolerance.
    return jnp.maximum(x, 0.0) + jnp.log(1.0 + jnp.exp(-jnp.abs(x)))


def _sigmoid(x):
    return 1.0 / (1.0 + jnp.exp(-x))


def _read_head_kernel(M, N, x_ref, wt_ref, b_ref, memt_ref, wlast_ref,
                      memout_ref, wout_ref):
    f32 = jnp.float32
    x = x_ref[...]            # (1, C)
    Wt = wt_ref[...]          # (C, N+6)
    b = b_ref[...]            # (1, N+6)
    mem_t = memt_ref[...]     # (N, M)  -- lane-dense transposed memory
    w_last = wlast_ref[...]   # (1, M)

    # ---- fc_read (Linear) ----
    param = jnp.dot(x, Wt, preferred_element_type=f32) + b              # (1, N+6)

    # ---- split + activations ----
    k = jnp.tanh(param[:, :N])                                          # (1, N)
    beta = _softplus(param[:, N:N + 1])                                 # (1, 1)
    g = _sigmoid(param[:, N + 1:N + 2])                                 # (1, 1)
    s_raw = param[:, N + 2:N + 5]                                       # (1, 3)
    gamma = 1.0 + _softplus(param[:, N + 5:N + 6])                      # (1, 1)

    # softmax over the 3 shift weights
    s_max = jnp.max(s_raw, axis=-1, keepdims=True)
    s_e = jnp.exp(s_raw - s_max)
    s = s_e * pl.reciprocal(jnp.sum(s_e, axis=-1, keepdims=True),
                            approx=False)                               # (1, 3)

    # ---- content addressing: cosine similarity against every memory row ----
    # mem_t is (N, M) so this is a plain (no transpose) MXU matmul with a
    # lane-dense (1, M) result.
    dot = jnp.dot(k, mem_t, preferred_element_type=f32)                 # (1, M)
    # Per-slot squared norms via a sublane reduction on 2 packed vregs
    # (was a ones-row MXU matmul on the (M, N) layout).
    # TODO(synk): m_sq only changes when memory is written; in a fused
    # multi-timestep kernel keep it in a resident VMEM scratch.
    m_sq = jnp.sum(mem_t * mem_t, axis=0, keepdims=True)                # (1, M)
    k_sq = jnp.sum(k * k, axis=-1, keepdims=True)                       # (1, 1)
    # rsqrt on the EUP instead of sqrt followed by a divide on the VPU.
    sim = dot * lax.rsqrt(jnp.maximum(k_sq * m_sq, 1e-32))              # (1, M)

    # softmax(beta * sim)
    z = beta * sim
    z_max = jnp.max(z, axis=-1, keepdims=True)
    z_e = jnp.exp(z - z_max)
    # approx=True (raw EUP vrcp, ~1e-4 rel. error) would exceed the 1e-5
    # verification tolerance; keep exact.
    wc = z_e * pl.reciprocal(jnp.sum(z_e, axis=-1, keepdims=True),
                             approx=False)                              # (1, M)

    # ---- interpolate with previous weights ----
    wg = g * wc + (1.0 - g) * w_last                                    # (1, M)

    # ---- circular 3-tap shift convolution ----
    # pltpu.roll = XLU lane rotation (same semantics as np.roll): O(M), no M x M
    # permutation matrices, no extra MXU pushes.
    wg_prev = pltpu.roll(wg, 1, 1)        # wg[(i-1) % M]
    wg_next = pltpu.roll(wg, M - 1, 1)    # wg[(i+1) % M]
    w_hat = (wg_prev * s[:, 0:1]
             + wg * s[:, 1:2]
             + wg_next * s[:, 2:3])                                     # (1, M)

    # ---- sharpen: w_hat ** gamma (clamped away from 0), then normalize ----
    w_pow = jnp.exp(gamma * jnp.log(jnp.maximum(w_hat, 1e-30)))
    w = w_pow * pl.reciprocal(jnp.sum(w_pow, axis=-1, keepdims=True) + 1e-16,
                              approx=False)                             # (1, M)

    # ---- read: contract the M dims of w (1, M) and mem_t (N, M) -> (1, N) ----
    dn = (((1,), (1,)), ((), ()))
    memout_ref[...] = lax.dot_general(w, mem_t, dn,
                                      preferred_element_type=f32)       # (1, N)
    wout_ref[...] = w


def read_head_forward(x, memory, w_last, Wt, b):
    M, N = memory.shape
    # Lane-dense layout: (N, M) = (16, 128) packs into 2 full vregs. In a full
    # rollout this transpose happens once (memory only changes on writes).
    mem_t = jnp.transpose(memory)
    kernel = functools.partial(_read_head_kernel, M, N)
    vmem = pl.BlockSpec(memory_space=pltpu.MemorySpace.VMEM)
    # TODO(synk): in a full NTM rollout the per-timestep calls should be fused into a
    # single pallas_call (grid over T) with memory / w_last kept resident in VMEM;
    # that cannot be done for the read head in isolation because each step's x comes
    # from the controller (which consumes the previous read).
    mem_out, w = pl.pallas_call(
        kernel,
        out_shape=(jax.ShapeDtypeStruct((1, N), jnp.float32),
                   jax.ShapeDtypeStruct((1, M), jnp.float32)),
        in_specs=[vmem, vmem, vmem, vmem, vmem],
        out_specs=(vmem, vmem),
        input_output_aliases={4: 1},   # w_last buffer -> new w (P8)
    )(x, Wt, b, mem_t, w_last)
    return mem_out, w


def init_params(key, controller_out, N):
    """fc_read: xavier_uniform_(gain=1.4) weight, normal(std=0.01) bias."""
    read_lengths = N + 6
    kw, kb = jax.random.split(key)
    bound = 1.4 * (6.0 / (controller_out + read_lengths)) ** 0.5
    W = jax.random.uniform(kw, (read_lengths, controller_out),
                           jnp.float32, -bound, bound)     # torch layout (out, in)
    bias = 0.01 * jax.random.normal(kb, (read_lengths,), jnp.float32)
    return W.T, bias.reshape(1, read_lengths)


def _reference(x, memory, w_last, Wt, b):
    """Pure-JAX mirror of the torch forward, for verification."""
    N = memory.shape[1]
    param = x @ Wt + b
    k = jnp.tanh(param[:, :N])
    beta = jax.nn.softplus(param[:, N:N + 1])
    g = jax.nn.sigmoid(param[:, N + 1:N + 2])
    s = jax.nn.softmax(param[:, N + 2:N + 5], axis=1)
    gamma = 1.0 + jax.nn.softplus(param[:, N + 5:N + 6])
    dot = k @ memory.T
    denom = jnp.maximum(jnp.linalg.norm(k, axis=-1, keepdims=True)
                        * jnp.linalg.norm(memory, axis=-1)[None, :], 1e-16)
    wc = jax.nn.softmax(beta * (dot / denom), axis=-1)
    wg = g * wc + (1.0 - g) * w_last
    w_hat = (jnp.roll(wg, 1, axis=-1) * s[:, 0:1]
             + wg * s[:, 1:2]
             + jnp.roll(wg, -1, axis=-1) * s[:, 2:3])
    w_pow = w_hat ** gamma
    w = w_pow / (jnp.sum(w_pow, axis=-1, keepdims=True) + 1e-16)
    return w @ memory, w


if __name__ == "__main__":
    # Classic NTM-ish sizes: 128 memory slots, word size 16, controller dim 32.
    # M = 128 keeps the addressing-weight vector lane-dense (one full vreg row).
    M, N, controller_out = 128, 16, 32
    key = jax.random.PRNGKey(0)
    k1, k2, k3 = jax.random.split(key, 3)

    Wt, b = init_params(k1, controller_out, N)
    x = jax.random.normal(k2, (1, controller_out), jnp.float32)
    memory = jax.random.normal(k3, (M, N), jnp.float32)
    w_last = jnp.zeros((1, M), jnp.float32)    # Memory.reset_memory()

    # Reference first (w_last's buffer may be aliased into the kernel's output).
    ref_mem, ref_w = _reference(x, memory, w_last, Wt, b)

    mem_out, w = read_head_forward(x, memory, w_last, Wt, b)
    jax.block_until_ready((mem_out, w))

    assert jnp.allclose(mem_out, ref_mem, atol=1e-5, rtol=1e-5)
    assert jnp.allclose(w, ref_w, atol=1e-5, rtol=1e-5)
    assert jnp.allclose(jnp.sum(w), 1.0, atol=1e-5)

    print("KERNEL_OK")
</pallas_src>

<mosaic_0001>
module attributes {stable_mosaic.version = 11 : i64} {
  func.func @_read_head_kernel(%arg0: memref<1x32xf32, #tpu.memory_space<vmem>>, %arg1: memref<32x22xf32, #tpu.memory_space<vmem>>, %arg2: memref<1x22xf32, #tpu.memory_space<vmem>>, %arg3: memref<16x128xf32, #tpu.memory_space<vmem>>, %arg4: memref<1x128xf32, #tpu.memory_space<vmem>>, %arg5: memref<1x16xf32, #tpu.memory_space<vmem>>, %arg6: memref<1x128xf32, #tpu.memory_space<vmem>>) attributes {dimension_semantics = [], scalar_prefetch = 0 : i64, scratch_operands = 0 : i64, tpu.core_type = #tpu.core_type<tc>} {
    %c0 = arith.constant 0 : index
    %c0_0 = arith.constant 0 : index
    %0 = vector.load %arg0[%c0, %c0_0] : memref<1x32xf32, #tpu.memory_space<vmem>>, vector<1x32xf32>
    %c0_1 = arith.constant 0 : index
    %c0_2 = arith.constant 0 : index
    %1 = vector.load %arg1[%c0_1, %c0_2] : memref<32x22xf32, #tpu.memory_space<vmem>>, vector<32x22xf32>
    %c0_3 = arith.constant 0 : index
    %c0_4 = arith.constant 0 : index
    %2 = vector.load %arg2[%c0_3, %c0_4] : memref<1x22xf32, #tpu.memory_space<vmem>>, vector<1x22xf32>
    %c0_5 = arith.constant 0 : index
    %c0_6 = arith.constant 0 : index
    %3 = vector.load %arg3[%c0_5, %c0_6] : memref<16x128xf32, #tpu.memory_space<vmem>>, vector<16x128xf32>
    %c0_7 = arith.constant 0 : index
    %c0_8 = arith.constant 0 : index
    %4 = vector.load %arg4[%c0_7, %c0_8] : memref<1x128xf32, #tpu.memory_space<vmem>>, vector<1x128xf32>
    %cst = arith.constant dense<0.000000e+00> : vector<1x22xf32>
    %5 = tpu.matmul %0, %1, %cst {dimension_numbers = #tpu.dot_dimension_numbers<[1], [0], [0], [1], [0, 0, 1, 1], [], []>} : vector<1x32xf32>, vector<32x22xf32>, vector<1x22xf32> -> vector<1x22xf32>
    %6 = arith.addf %5, %2 : vector<1x22xf32>
    %7 = vector.extract_strided_slice %6 {offsets = [0, 0], sizes = [1, 16], strides = [1, 1]} : vector<1x22xf32> to vector<1x16xf32>
    %8 = math.tanh %7 : vector<1x16xf32>
    %9 = vector.extract_strided_slice %6 {offsets = [0, 16], sizes = [1, 1], strides = [1, 1]} : vector<1x22xf32> to vector<1x1xf32>
    %cst_9 = arith.constant 0.000000e+00 : f32
    %10 = vector.broadcast %cst_9 : f32 to vector<1x1xf32>
    %11 = arith.maximumf %9, %10 : vector<1x1xf32>
    %12 = math.absf %9 : vector<1x1xf32>
    %cst_10 = arith.constant 0.000000e+00 : f32
    %13 = vector.broadcast %cst_10 : f32 to vector<1x1xf32>
    %14 = arith.subf %13, %12 : vector<1x1xf32>
    %15 = math.exp %14 : vector<1x1xf32>
    %cst_11 = arith.constant 1.000000e+00 : f32
    %16 = vector.broadcast %cst_11 : f32 to vector<1x1xf32>
    %17 = arith.addf %16, %15 : vector<1x1xf32>
    %18 = math.log %17 : vector<1x1xf32>
    %19 = arith.addf %11, %18 : vector<1x1xf32>
    %20 = vector.extract_strided_slice %6 {offsets = [0, 17], sizes = [1, 1], strides = [1, 1]} : vector<1x22xf32> to vector<1x1xf32>
    %cst_12 = arith.constant 0.000000e+00 : f32
    %21 = vector.broadcast %cst_12 : f32 to vector<1x1xf32>
    %22 = arith.subf %21, %20 : vector<1x1xf32>
    %23 = math.exp %22 : vector<1x1xf32>
    %cst_13 = arith.constant 1.000000e+00 : f32
    %24 = vector.broadcast %cst_13 : f32 to vector<1x1xf32>
    %25 = arith.addf %24, %23 : vector<1x1xf32>
    %cst_14 = arith.constant 1.000000e+00 : f32
    %26 = vector.broadcast %cst_14 : f32 to vector<1x1xf32>
    %27 = arith.divf %26, %25 : vector<1x1xf32>
    %28 = vector.extract_strided_slice %6 {offsets = [0, 18], sizes = [1, 3], strides = [1, 1]} : vector<1x22xf32> to vector<1x3xf32>
    %29 = vector.extract_strided_slice %6 {offsets = [0, 21], sizes = [1, 1], strides = [1, 1]} : vector<1x22xf32> to vector<1x1xf32>
    %cst_15 = arith.constant 0.000000e+00 : f32
    %30 = vector.broadcast %cst_15 : f32 to vector<1x1xf32>
    %31 = arith.maximumf %29, %30 : vector<1x1xf32>
    %32 = math.absf %29 : vector<1x1xf32>
    %cst_16 = arith.constant 0.000000e+00 : f32
    %33 = vector.broadcast %cst_16 : f32 to vector<1x1xf32>
    %34 = arith.subf %33, %32 : vector<1x1xf32>
    %35 = math.exp %34 : vector<1x1xf32>
    %cst_17 = arith.constant 1.000000e+00 : f32
    %36 = vector.broadcast %cst_17 : f32 to vector<1x1xf32>
    %37 = arith.addf %36, %35 : vector<1x1xf32>
    %38 = math.log %37 : vector<1x1xf32>
    %39 = arith.addf %31, %38 : vector<1x1xf32>
    %cst_18 = arith.constant 1.000000e+00 : f32
    %40 = vector.broadcast %cst_18 : f32 to vector<1x1xf32>
    %41 = arith.addf %40, %39 : vector<1x1xf32>
    %cst_19 = arith.constant dense<0xFF800000> : vector<1xf32>
    %42 = vector.multi_reduction <maximumf>, %28, %cst_19 [1] : vector<1x3xf32> to vector<1xf32>
    %43 = vector.shape_cast %42 : vector<1xf32> to vector<1x1xf32>
    %44 = vector.broadcast %43 : vector<1x1xf32> to vector<1x3xf32>
    %45 = arith.subf %28, %44 : vector<1x3xf32>
    %46 = math.exp %45 : vector<1x3xf32>
    %cst_20 = arith.constant dense<0.000000e+00> : vector<1xf32>
    %47 = vector.multi_reduction <add>, %46, %cst_20 [1] : vector<1x3xf32> to vector<1xf32>
    %48 = vector.shape_cast %47 : vector<1xf32> to vector<1x1xf32>
    %49 = tpu.reciprocal %48 : vector<1x1xf32> -> vector<1x1xf32>
    %50 = vector.broadcast %49 : vector<1x1xf32> to vector<1x3xf32>
    %51 = arith.mulf %46, %50 : vector<1x3xf32>
    %cst_21 = arith.constant dense<0.000000e+00> : vector<1x128xf32>
    %52 = tpu.matmul %8, %3, %cst_21 {dimension_numbers = #tpu.dot_dimension_numbers<[1], [0], [0], [1], [0, 0, 1, 1], [], []>} : vector<1x16xf32>, vector<16x128xf32>, vector<1x128xf32> -> vector<1x128xf32>
    %53 = arith.mulf %3, %3 : vector<16x128xf32>
    %cst_22 = arith.constant dense<0.000000e+00> : vector<128xf32>
    %54 = vector.multi_reduction <add>, %53, %cst_22 [0] : vector<16x128xf32> to vector<128xf32>
    %55 = vector.shape_cast %54 : vector<128xf32> to vector<1x128xf32>
    %56 = arith.mulf %8, %8 : vector<1x16xf32>
    %cst_23 = arith.constant dense<0.000000e+00> : vector<1xf32>
    %57 = vector.multi_reduction <add>, %56, %cst_23 [1] : vector<1x16xf32> to vector<1xf32>
    %58 = vector.shape_cast %57 : vector<1xf32> to vector<1x1xf32>
    %59 = vector.broadcast %58 : vector<1x1xf32> to vector<1x128xf32>
    %60 = arith.mulf %59, %55 : vector<1x128xf32>
    %cst_24 = arith.constant 1.000000e-32 : f32
    %61 = vector.broadcast %cst_24 : f32 to vector<1x128xf32>
    %62 = arith.maximumf %60, %61 : vector<1x128xf32>
    %63 = math.rsqrt %62 : vector<1x128xf32>
    %64 = arith.mulf %52, %63 : vector<1x128xf32>
    %65 = vector.broadcast %19 : vector<1x1xf32> to vector<1x128xf32>
    %66 = arith.mulf %65, %64 : vector<1x128xf32>
    %cst_25 = arith.constant dense<0xFF800000> : vector<1xf32>
    %67 = vector.multi_reduction <maximumf>, %66, %cst_25 [1] : vector<1x128xf32> to vector<1xf32>
    %68 = vector.shape_cast %67 : vector<1xf32> to vector<1x1xf32>
    %69 = vector.broadcast %68 : vector<1x1xf32> to vector<1x128xf32>
    %70 = arith.subf %66, %69 : vector<1x128xf32>
    %71 = math.exp %70 : vector<1x128xf32>
    %cst_26 = arith.constant dense<0.000000e+00> : vector<1xf32>
    %72 = vector.multi_reduction <add>, %71, %cst_26 [1] : vector<1x128xf32> to vector<1xf32>
    %73 = vector.shape_cast %72 : vector<1xf32> to vector<1x1xf32>
    %74 = tpu.reciprocal %73 : vector<1x1xf32> -> vector<1x1xf32>
    %75 = vector.broadcast %74 : vector<1x1xf32> to vector<1x128xf32>
    %76 = arith.mulf %71, %75 : vector<1x128xf32>
    %77 = vector.broadcast %27 : vector<1x1xf32> to vector<1x128xf32>
    %78 = arith.mulf %77, %76 : vector<1x128xf32>
    %cst_27 = arith.constant 1.000000e+00 : f32
    %79 = vector.broadcast %cst_27 : f32 to vector<1x1xf32>
    %80 = arith.subf %79, %27 : vector<1x1xf32>
    %81 = vector.broadcast %80 : vector<1x1xf32> to vector<1x128xf32>
    %82 = arith.mulf %81, %4 : vector<1x128xf32>
    %83 = arith.addf %78, %82 : vector<1x128xf32>
    %c1_i32 = arith.constant 1 : i32
    %84 = tpu.dynamic_rotate %83 by %c1_i32 dim 1 : vector<1x128xf32>, i32 -> vector<1x128xf32>
    %c127_i32 = arith.constant 127 : i32
    %85 = tpu.dynamic_rotate %83 by %c127_i32 dim 1 : vector<1x128xf32>, i32 -> vector<1x128xf32>
    %86 = vector.extract_strided_slice %51 {offsets = [0, 0], sizes = [1, 1], strides = [1, 1]} : vector<1x3xf32> to vector<1x1xf32>
    %87 = vector.broadcast %86 : vector<1x1xf32> to vector<1x128xf32>
    %88 = arith.mulf %84, %87 : vector<1x128xf32>
    %89 = vector.extract_strided_slice %51 {offsets = [0, 1], sizes = [1, 1], strides = [1, 1]} : vector<1x3xf32> to vector<1x1xf32>
    %90 = vector.broadcast %89 : vector<1x1xf32> to vector<1x128xf32>
    %91 = arith.mulf %83, %90 : vector<1x128xf32>
    %92 = arith.addf %88, %91 : vector<1x128xf32>
    %93 = vector.extract_strided_slice %51 {offsets = [0, 2], sizes = [1, 1], strides = [1, 1]} : vector<1x3xf32> to vector<1x1xf32>
    %94 = vector.broadcast %93 : vector<1x1xf32> to vector<1x128xf32>
    %95 = arith.mulf %85, %94 : vector<1x128xf32>
    %96 = arith.addf %92, %95 : vector<1x128xf32>
    %cst_28 = arith.constant 1.000000e-30 : f32
    %97 = vector.broadcast %cst_28 : f32 to vector<1x128xf32>
    %98 = arith.maximumf %96, %97 : vector<1x128xf32>
    %99 = math.log %98 : vector<1x128xf32>
    %100 = vector.broadcast %41 : vector<1x1xf32> to vector<1x128xf32>
    %101 = arith.mulf %100, %99 : vector<1x128xf32>
    %102 = math.exp %101 : vector<1x128xf32>
    %cst_29 = arith.constant dense<0.000000e+00> : vector<1xf32>
    %103 = vector.multi_reduction <add>, %102, %cst_29 [1] : vector<1x128xf32> to vector<1xf32>
    %104 = vector.shape_cast %103 : vector<1xf32> to vector<1x1xf32>
    %cst_30 = arith.constant 1.000000e-16 : f32
    %105 = vector.broadcast %cst_30 : f32 to vector<1x1xf32>
    %106 = arith.addf %104, %105 : vector<1x1xf32>
    %107 = tpu.reciprocal %106 : vector<1x1xf32> -> vector<1x1xf32>
    %108 = vector.broadcast %107 : vector<1x1xf32> to vector<1x128xf32>
    %109 = arith.mulf %102, %108 : vector<1x128xf32>
    %cst_31 = arith.constant dense<0.000000e+00> : vector<1x16xf32>
    %110 = tpu.matmul %109, %3, %cst_31 {dimension_numbers = #tpu.dot_dimension_numbers<[1], [1], [0], [0], [0, 0, 1, 0], [], []>} : vector<1x128xf32>, vector<16x128xf32>, vector<1x16xf32> -> vector<1x16xf32>
    %c0_32 = arith.constant 0 : index
    %c0_33 = arith.constant 0 : index
    %111 = vector.load %arg5[%c0_32, %c0_33] : memref<1x16xf32, #tpu.memory_space<vmem>>, vector<1x16xf32>
    tpu.vector_store %arg5[%c0_32, %c0_33], %110 {strides = array<i32>} : memref<1x16xf32, #tpu.memory_space<vmem>>, vector<1x16xf32>,
    %c0_34 = arith.constant 0 : index
    %c0_35 = arith.constant 0 : index
    %112 = vector.load %arg6[%c0_34, %c0_35] : memref<1x128xf32, #tpu.memory_space<vmem>>, vector<1x128xf32>
    tpu.vector_store %arg6[%c0_34, %c0_35], %109 {strides = array<i32>} : memref<1x128xf32, #tpu.memory_space<vmem>>, vector<1x128xf32>,
    return
  }
}

</mosaic_0001>

<bundles_post_ra>
// kernel: tpu_custom_call.1
= control target key start
LH: loop header
LB: loop body
LE: loop exit
PB: predicated region body
PF: predicated region fallthrough
CT: control target
= control target key end

     0   :  { %12 = vsyncpa [#allocation3], 0  ;;  %s709_s0 = inlined_call_operand.vmem [shape: f32[1,32], index: 0, kind: input, shape index: {}]   ;;  %s710_s1 = inlined_call_operand.vmem [shape: f32[32,22], index: 1, kind: input, shape index: {}]   ;;  %s711_s2 = inlined_call_operand.vmem [shape: f32[1,22], index: 2, kind: input, shape index: {}]   ;;  %s712_s3 = inlined_call_operand.vmem [shape: f32[16,128], index: 3, kind: input, shape index: {}]   ;;  %s713_s4 = inlined_call_operand.hbm [shape: f32[1,128], index: 4, kind: input, shape index: {}, may-alias: {4,6}]   ;;  %s714_s5 = inlined_call_operand.hbm [shape: f32[1,16], index: 5, kind: output, shape index: {0}]   ;;  %s715_s6 = inlined_call_operand.hbm [shape: f32[1,128], index: 6, kind: output, shape index: {1}, may-alias: {4,6}]  }
   0x1   :  { %13 = vsyncpa [#allocation4], 0 }
   0x2   :  { %14 = vsyncpa [#allocation7], 0  ;;  %s587_s21 = smov [#allocation2]   ;;  %s515_s25 = scalar_lea.hbm %s713_s4, 16 }
   0x3   :  { %s29_s22 = sshll.u32 %s587_s21, 4  ;;  %p516_p0 = scmp.ne.s32.totalorder %s713_s4, %s515_s25  ;;  %s30_s22 = int_to_ptr.vmem [resolvable:$true] %s29_s22 }
   0x4   :  { %p519_p1 = scmp.lt.u32.totalorder %s515_s25, %s713_s4 }
   0x6   :  { %p521_p2 = pnand %p519_p1, %p516_p0 }
   0x8   :  { %524 = shalt.err (!%p521_p2)
}
   0x9   :  { %s525_s30 = scalar_lea.vmem %s30_s22, 16  ;;  %s529_s7 = scalar_lea.vmem %s30_s22, 32 }
   0xa   :  { %p526_p3 = scmp.ne.s32.totalorder %s30_s22, %s525_s30  ;;  %p530_p4 = scmp.lt.s32.totalorder %s30_s22, %s30_s22 }
   0xb   :  { %p531_p5 = scmp.lt.s32.totalorder %s529_s7, %s525_s30 }
   0xd   :  { %p532_p6 = por %p531_p5, %p530_p4 }
   0xf   :  { %p533_p7 = pnand %p532_p6, %p526_p3 }
  0x11   :  { %536 = shalt.err (!%p533_p7)
}
  0x12   :  { %32 = dma.hbm_to_vmem [thread:$0]  %s713_s4, 16, %s30_s22, [#allocation3]  }
  0x13   :  { %581 = dma.done.wait [#allocation3], 16  }
  0x14   :  { %582 = vsyncadd [#allocation3], 4294967280  ;;  %v588_v0 = vmov 0.0|0.0   ;;  %vm589_vm0 = vmmov 0   ;;  %v590_v1 = vmov 0.0   ;;  %v37_v2 = vld [vmem:[%s710_s1] sm:$0xff] }
  0x15   :  { %455 = vmatprep.subr.bf16.mxu0 %v588_v0  ;;  %438 = vmatprep.mubr.msk.f32.mxu0 %vm589_vm0, %v590_v1  ;;  %v38_v3 = vld [vmem:[%s710_s1 + $0x8] sm:$0xff]  ;;  %v39_v4 = vld [vmem:[%s710_s1 + $0x10] sm:$0xff]  ;;  %v40_v6 = vld [vmem:[%s710_s1 + $0x18] sm:$0xff]  ;;  %vm45_vm1 = vcmask 261120   ;;  %v591_v14 = vmov 16   ;;  %vm136_vm2 = vcmask 163984  }
  0x16   :  { %461 = vmatprep.subr.bf16.mxu1 %v588_v0  ;;  %445 = vmatprep.mubr.msk.f32.mxu1 %vm589_vm0, %v590_v1  ;;  %v456_v5 = vpack.c.bf16 %v38_v3, %v37_v2  ;;  %v459_v7 = vpack.c.bf16 %v40_v6, %v39_v4  ;;  %v36_v8 = vld [vmem:[%s709_s0] sm:$0x1]  ;;  %v43_v10 = vld [vmem:[%s712_s3 + $0x8] sm:$0xff]  ;;  %vm153_vm3 = vcmask 130048   ;;  %vm237_vm4 = vcmask 122880   ;;  %s599_s23 = smov 127  }
  0x17   :  { %v42_v9 = vld [vmem:[%s712_s3] sm:$0xff]  ;;  %v228_v13 = vmul.f32 %v43_v10, %v43_v10  ;;  %482 = vset.pattern.permute.xlu0 %v591_v14  ;;  %vm251_vm5 = vcmask 1040384   ;;  %v593_v53 = vmov 17   ;;  %vm147_vm6 = vcmask 16384   ;;  %s598_s3 = smov 1   ;;  %s600_s24 = smov [#allocation6]  }
  0x18   :  { %457 = vmatpush3.bf16.msra.mxu0 %v456_v5  ;;  %v462_v11 = vpack.c.bf16 %v43_v10, %v42_v9  ;;  %v227_v12 = vmul.f32 %v42_v9, %v42_v9  ;;  %v41_v16 = vld [vmem:[%s711_s2] sm:$0x1]  ;;  %s592_s2 = smov 110   ;;  %483 = vset.pattern.permute.xlu1 %v593_v53  ;;  %v594_v3 = vmov 18   ;;  %v595_v4 = vmov 19   ;;  %s404_s25 = sshll.u32 %s600_s24, 4  ;;  %s405_s25 = int_to_ptr.vmem [resolvable:$true] %s404_s25 }
  0x19   :  { %458 = vmatprep.subr.bf16.mxu0 %v588_v0  ;;  %v596_v10 = vmov 20   ;;  %s537_s26 = scalar_lea.vmem %s405_s25, 16  ;;  %s541_s27 = scalar_lea.vmem %s405_s25, 32 }
  0x1a   :  { %463 = vmatpush3.bf16.msra.mxu1 %v462_v11  ;;  %v229_v15 = vadd.f32 %v228_v13, %v227_v12  ;;  %v44_v13 = vld [vmem:[#allocation2] sm:$0x1]  ;;  %p538_p8 = scmp.ne.s32.totalorder %s405_s25, %s537_s26  ;;  %p542_p9 = scmp.lt.s32.totalorder %s405_s25, %s405_s25 }
  0x1b   :  { %464 = vmatprep.subr.bf16.mxu1 %v588_v0  ;;  %p543_p10 = scmp.lt.s32.totalorder %s541_s27, %s537_s26 }
  0x1c   :  { %460 = vmatpush3.bf16.msra.mxu0 %v459_v7  ;;  %v230_v33 = vrot.slane %v229_v15, 4 }
  0x1d   :  { %p544_p11 = por %p543_p10, %p542_p9 }
  0x1e   :  { %v231_v34 = vadd.f32 %v230_v33, %v229_v15 }
  0x1f   :  { %439 = vmatmul.mubr.msk.f32.vlgmr.msra.gmra.mrb[0].mxu0 %vm45_vm1, %v36_v8  ;;  %p545_p12 = pnand %p544_p11, %p538_p8 }
  0x20   :  { %v232_v35 = vrot.slane %v231_v34, 2 }
  0x22   :  { %v233_v36 = vadd.f32 %v232_v35, %v231_v34 }
  0x24   :  { %v234_v37 = vrot.slane %v233_v36, 1 }
  0x26   :  { %v235_v38 = vadd.f32 %v234_v37, %v233_v36 }
  0xf2   :  { %v115_v17 = vpop.f32.mrb[0].mxu0 }
  0xf3   :  { %v116_v18 = vadd.f32 %v115_v17, %v41_v16  ;;  %v440_v19 = vpop.f32.mrb[1].mxu0 }
  0xf5   :  { %489 = vtanh.f32 %v116_v18  ;;  %v137_v20 = vsel %vm136_vm2, %v116_v18, -inf  ;;  %v121_v21 = vand.u32 2147483647, %v116_v18  ;;  %v120_v31 = vmax.f32 %v116_v18, 0.0 }
  0xf6   :  { %138 = vmax.xlane.f32.xlu1 %v137_v20  ;;  %v129_v54 = vsub.f32 0.0, %v116_v18 }
  0xf7   :  { %v122_v22 = vsub.f32 0.0, %v121_v21 }
  0xf8   :  { %v130_v55 = vmul.f32 1.442695, %v129_v54 }
  0xf9   :  { %v123_v23 = vmul.f32 1.442695, %v122_v22 }
  0xfb   :  { %491 = vpow2.f32 %v123_v23 }
  0xff   :  { %v490_v24 = vpop.eup %489 }
 0x100   :  { %446 = vmatmul.mubr.msk.f32.vlgmr.msra.gmra.mrb[0].mxu1 %vm153_vm3, %v490_v24  ;;  %v236_v25 = vmul.f32 %v490_v24, %v490_v24 }
 0x101   :  { %466 = vmatpush3.bf16.xpose.msra.mxu1 %v462_v11  ;;  %452 = vmatprep.mubr.msk.f32.mxu1 %vm589_vm0, %v590_v1  ;;  %v597_v11 = vmov 21  }
 0x102   :  { %v238_v26 = vsel %vm237_vm4, %v236_v25, 0.0 }
 0x103   :  { %239 = vadd.xlane.f32.xlu0 %v238_v26 }
 0x105   :  { %v492_v27 = vpop.eup %491 }
 0x106   :  { %v125_v28 = vadd.f32 1.0, %v492_v27 }
 0x108   :  { %493 = vlog2.f32 %v125_v28 }
 0x112   :  { %v494_v29 = vpop.eup %493 }
 0x113   :  { %v127_v30 = vmul.f32 0.6931472, %v494_v29 }
 0x115   :  { %v677_v32 = vadd.f32 %v127_v30, %v120_v31 }
 0x117   :  { %v135_v19 = vadd.f32 1.0, %v677_v32 }
 0x119   :  { %247 = vperm.xlu0 %482, %v677_v32  }
 0x11d   :  { %484 = vset.pattern.permute.xlu0 %v594_v3 }
 0x183   :  { %v139_v44 = vpop.xlane.xlu1 %138 }
 0x184   :  { %v140_v49 = vsub.f32 %v116_v18, %v139_v44 }
 0x186   :  { %v141_v51 = vmul.f32 1.442695, %v140_v49 }
 0x190   :  { %v240_v39 = vpop.xlane.xlu0 %239 }
 0x191   :  { %v241_v40 = vmul.f32 %v240_v39, %v235_v38 }
 0x193   :  { %v242_v41 = vmax.f32 %v241_v40, 1e-32 }
 0x195   :  { %495 = vrsqrt.f32 %v242_v41 }
 0x196   :  { %497 = vpow2.f32 %v141_v51 }
 0x197   :  { %499 = vpow2.f32 %v130_v55 }
 0x198   :  { %v248_v47 = vpop.permute.xlu0 %247 }
 0x19f   :  { %v496_v42 = vpop.eup %495 }
 0x1a0   :  { %v498_v52 = vpop.eup %497 }
 0x1a1   :  { %v500_v60 = vpop.eup %499 }
 0x1a2   :  { %v132_v62 = vadd.f32 1.0, %v500_v60 }
 0x1d3   :  { %v223_v43 = vpop.f32.mrb[0].mxu1 }
 0x1d4   :  { %v244_v45 = vmul.f32 %v496_v42, %v223_v43  ;;  %v447_v46 = vpop.f32.mrb[1].mxu1 }
 0x1d6   :  { %v250_v48 = vmul.f32 %v248_v47, %v244_v45 }
 0x1d8   :  { %v252_v50 = vsel %vm251_vm5, %v250_v48, -inf }
 0x1d9   :  { %253 = vmax.xlane.f32.xlu1 %v252_v50 }
 0x1ea   :  { %144 = vrot.lane.b32.xlu1 %v498_v52, %s592_s2 }
 0x266   :  { %v254_v56 = vpop.xlane.xlu1 %253 }
 0x267   :  { %v255_v57 = vsub.f32 %v250_v48, %v254_v56 }
 0x269   :  { %v256_v58 = vmul.f32 1.442695, %v255_v57 }
 0x26a   :  { %v145_v59 = vpop.permute.xlu1 %144 }
 0x26b   :  { %501 = vpow2.f32 %v256_v58  ;;  %v148_v61 = vsel %vm147_vm6, %v145_v59, 0.0 }
 0x26c   :  { %149 = vadd.xlane.f32.xlu1 %v148_v61  ;;  %503 = vrcp.f32 %v132_v62 }
 0x275   :  { %v502_v63 = vpop.eup %501 }
 0x276   :  { %v258_v0 = vsel %vm251_vm5, %v502_v63, 0.0  ;;  %v504_v1 = vpop.eup %503 }
 0x277   :  { %259 = vadd.xlane.f32.xlu0 %v258_v0  ;;  %v269_v2 = vsub.f32 1.0, %v504_v1 }
 0x27d   :  { %265 = vperm.xlu1 %483, %v504_v1  }
 0x281   :  { %272 = vperm.xlu1 %483, %v269_v2  }
 0x285   :  { %485 = vset.pattern.permute.xlu1 %v595_v4 }
 0x2f9   :  { %v150_v5 = vpop.xlane.xlu1 %149 }
 0x2fa   :  { %505 = vrcp.f32 %v150_v5 }
 0x2fd   :  { %v266_v9 = vpop.permute.xlu1 %265 }
 0x301   :  { %v273_v14 = vpop.permute.xlu1 %272 }
 0x302   :  { %v275_v16 = vmul.f32 %v273_v14, %v44_v13 }
 0x304   :  { %v506_v6 = vpop.eup %505  ;;  %v260_v7 = vpop.xlane.xlu0 %259 }
 0x305   :  { %507 = vrcp.f32 %v260_v7  ;;  %v152_v8 = vmul.f32 %v506_v6, %v498_v52 }
 0x307   :  { %288 = vperm.xlu1 %485, %v152_v8   ;;  %283 = vperm.xlu0 %484, %v152_v8  }
 0x30b   :  { %486 = vset.pattern.permute.xlu1 %v596_v10  ;;  %488 = vset.pattern.permute.xlu0 %v597_v11 }
 0x30c   :  { %294 = vperm.xlu1 %486, %v152_v8  }
 0x30f   :  { %v508_v12 = vpop.eup %507 }
 0x310   :  { %v262_v15 = vmul.f32 %v508_v12, %v502_v63  ;;  %487 = vset.pattern.permute.xlu1 %v597_v11 }
 0x312   :  { %v268_v17 = vmul.f32 %v266_v9, %v262_v15 }
 0x314   :  { %v276_v18 = vadd.f32 %v275_v16, %v268_v17 }
 0x316   :  { %277 = vrot.lane.b32.xlu1 %v276_v18, %s598_s3 }
 0x31a   :  { %279 = vrot.lane.b32.xlu1 %v276_v18, %s599_s23 }
 0x31e   :  { %304 = vperm.xlu1 %487, %v135_v19  }
 0x386   :  { %v289_v20 = vpop.permute.xlu1 %288  ;;  %v284_v22 = vpop.permute.xlu0 %283 }
 0x387   :  { %v291_v25 = vmul.f32 %v289_v20, %v276_v18 }
 0x38b   :  { %v295_v21 = vpop.permute.xlu1 %294 }
 0x38f   :  { %v278_v23 = vpop.permute.xlu1 %277 }
 0x390   :  { %v286_v24 = vmul.f32 %v284_v22, %v278_v23 }
 0x392   :  { %v292_v27 = vadd.f32 %v291_v25, %v286_v24 }
 0x393   :  { %v280_v26 = vpop.permute.xlu1 %279 }
 0x394   :  { %v297_v28 = vmul.f32 %v295_v21, %v280_v26 }
 0x396   :  { %v298_v29 = vadd.f32 %v297_v28, %v292_v27 }
 0x398   :  { %v299_v30 = vmax.f32 %v298_v29, 1e-30 }
 0x39a   :  { %509 = vlog2.f32 %v299_v30 }
 0x39d   :  { %v305_v34 = vpop.permute.xlu1 %304 }
 0x3a4   :  { %v510_v31 = vpop.eup %509 }
 0x3a5   :  { %v301_v33 = vmul.f32 0.6931472, %v510_v31 }
 0x3a7   :  { %v307_v35 = vmul.f32 %v305_v34, %v301_v33 }
 0x3a9   :  { %v308_v36 = vmul.f32 1.442695, %v307_v35 }
 0x3ab   :  { %511 = vpow2.f32 %v308_v36 }
 0x3b5   :  { %v512_v32 = vpop.eup %511 }
 0x3b6   :  { %v310_v37 = vsel %vm251_vm5, %v512_v32, 0.0 }
 0x3b7   :  { %311 = vadd.xlane.f32.xlu1 %v310_v37 }
 0x444   :  { %v312_v38 = vpop.xlane.xlu1 %311 }
 0x445   :  { %v313_v39 = vadd.f32 1e-16, %v312_v38 }
 0x447   :  { %513 = vrcp.f32 %v313_v39 }
 0x451   :  { %v514_v40 = vpop.eup %513 }
 0x452   :  { %v315_v41 = vmul.f32 %v514_v40, %v512_v32 }
 0x454   :  { %453 = vmatmul.mubr.f32.vlgmr.msra.gmra.mrb[2].mxu1 %v315_v41  ;;  %387 = vst [vmem:[#allocation6] sm:$0x1] %v315_v41 }
 0x455   :  { %548 = shalt.err (!%p545_p12)
}
 0x456   :  { %s549_s30 = scalar_lea.hbm %s715_s6, 16 }
 0x457   :  { %p550_p13 = scmp.ne.s32.totalorder %s715_s6, %s549_s30  ;;  %p553_p0 = scmp.lt.u32.totalorder %s549_s30, %s715_s6 }
 0x459   :  { %p555_p1 = pnand %p553_p0, %p550_p13 }
 0x45b   :  { %558 = shalt.err (!%p555_p1)
}
 0x45c   :  { %407 = dma.vmem_to_hbm [thread:$0]  %s405_s25, 16, %s715_s6, [#allocation7]  }
 0x45d   :  { %s601_s13 = smov [#allocation5]  }
 0x45e   :  { %s394_s4 = sshll.u32 %s601_s13, 4  ;;  %s395_s4 = int_to_ptr.vmem [resolvable:$true] %s394_s4 }
 0x45f   :  { %s559_s14 = scalar_lea.vmem %s395_s4, 16  ;;  %s563_s15 = scalar_lea.vmem %s395_s4, 32 }
 0x460   :  { %p560_p2 = scmp.ne.s32.totalorder %s395_s4, %s559_s14  ;;  %p564_p3 = scmp.lt.s32.totalorder %s395_s4, %s395_s4 }
 0x461   :  { %p565_p4 = scmp.lt.s32.totalorder %s563_s15, %s559_s14 }
 0x463   :  { %p566_p5 = por %p565_p4, %p564_p3 }
 0x465   :  { %p567_p6 = pnand %p566_p5, %p560_p2 }
 0x527   :  { %v382_v42 = vpop.f32.mrb[2].mxu1 }
 0x528   :  { %386 = vst.msk [vmem:[#allocation5] sm:$0x1] %vm237_vm4, %v382_v42  ;;  %v454_v43 = vpop.f32.mrb[3].mxu1 }
 0x529   :  { %570 = shalt.err (!%p567_p6)
}
 0x52a   :  { %s571_s18 = scalar_lea.hbm %s714_s5, 16 }
 0x52b   :  { %p572_p7 = scmp.ne.s32.totalorder %s714_s5, %s571_s18  ;;  %p575_p8 = scmp.lt.u32.totalorder %s571_s18, %s714_s5 }
 0x52d   :  { %p577_p9 = pnand %p575_p8, %p572_p7 }
 0x52f   :  { %580 = shalt.err (!%p577_p9)
}
 0x530   :  { %397 = dma.vmem_to_hbm [thread:$0]  %s395_s4, 16, %s714_s5, [#allocation4]  }
 0x531   :  { %583 = dma.done.wait [#allocation4], 16  }
 0x532   :  { %584 = vsyncadd [#allocation4], 4294967280 }
 0x533   :  { %585 = dma.done.wait [#allocation7], 16  }
 0x534   :  { %586 = vsyncadd [#allocation7], 4294967280 }
 0x535   :  { %414 = vsyncpa [#allocation3], 1 }
 0x536   :  { %415 = vsyncpa [#allocation4], 1 }
 0x537   :  { %416 = vsyncpa [#allocation7], 1 }

</bundles_post_ra>
